<compile_context>
chip_gen: v6e
topology: v6e:2x2x1
jax: 0.10.0
libtpu: 0.0.40
codegen_flags: <defaults>
</compile_context>

<pallas_src>
import jax
import jax.numpy as jnp
from jax.experimental import pallas as pl
from jax.experimental.pallas import tpu as pltpu


def _mixed_matmul_kernel(w_ref, x_ref, y_ref):
    """One (batch-group, spatial-tile) grid cell of the mixed-op forward.

    w_ref : VMEM (1, G*C_out, G*C)  block-diagonal mixture-folded weight (f32)
    x_ref : VMEM (1, G*C, TS)       channels-first input tile, spatial in lanes (f32)
    y_ref : VMEM (1, G*C_out, TS)   output tile (lane-dense, unmasked stores)
    """
    y_ref[0] = jnp.dot(
        w_ref[0], x_ref[0], preferred_element_type=jnp.float32
    ).astype(y_ref.dtype)


def _pick_batch_group(batch, c_in, c_out, cap=128):
    """Largest divisor G of batch with G*max(c_in, c_out) <= cap (safe on all MXUs)."""
    gmax = max(1, cap // max(c_in, c_out))
    for g in range(min(batch, gmax), 0, -1):
        if batch % g == 0:
            return g
    return 1


def _pick_spatial_tile(s_pad, n_groups, rows_in, rows_out,
                       max_tile=32768, vmem_budget=12 * 1024 * 1024):
    """TS: multiple of 128 dividing s_pad, as large as the VMEM budget allows,
    preferring a total grid of >= 2 cells (v7x megacore load balance)."""
    per_lane = 2 * 4 * (rows_in + rows_out)      # double-buffered f32 in + out, per lane
    cap = max(128, min(max_tile, (vmem_budget // per_lane) // 128 * 128))
    n = s_pad // 128
    cands = sorted({d * 128 for d in range(1, n + 1) if n % d == 0}, reverse=True)
    viable = [ts for ts in cands if ts <= cap] or [128]
    multi = [ts for ts in viable if n_groups * (s_pad // ts) >= 2]
    return multi[0] if multi else viable[0]


def gumbel_softmax_sample(key, logits, temperature, axis=0):
    # JAX equivalent of the PyTorch gumbel_softmax_sample helper.
    g = jax.random.gumbel(key, logits.shape, dtype=logits.dtype)
    return jax.nn.softmax((logits + g) / temperature, axis=axis)


def mixed_module_forward(x_nchw, op_weights, arch_params, temperature, ops_cost,
                         *, key=None, weights=None, gene=None,
                         out_dtype=jnp.float32):
    """Mirror of MixedModule.forward.

    x_nchw     : (B, C, H, W)      activation (PyTorch NCHW convention)
    op_weights : (K, C_out, C_in)  1x1-conv weight of each candidate op
    arch_params: (K, 1)            gumble_arch_params
    temperature: scalar            gumbel_temperature
    ops_cost   : (K,)              ops_cost buffer
    out_dtype  : output dtype (set jnp.bfloat16 to halve store traffic if the
                 consumer tolerates it; accumulation is always f32)
    """
    assert weights is None or gene is None
    B, C, H, W = x_nchw.shape
    K, C_out, C_in = op_weights.shape
    assert C_in == C
    S = H * W

    if weights is None and gene is None:
        assert key is not None, "need a PRNG key to sample gumbel-softmax weights"
        logits = jnp.broadcast_to(arch_params, (K, B))           # expand(-1, batch)
        weights = gumbel_softmax_sample(key, logits, temperature, axis=0)
    if gene is not None:
        # One-hot mixture reproduces the "gene" branch exactly.
        weights = jnp.broadcast_to(
            jax.nn.one_hot(gene, K, dtype=jnp.float32).reshape(K, 1), (K, B))
    weights = weights.astype(jnp.float32)

    # flops[b] = sum_k weights[k, b] * ops_cost[k]   (tiny; stays in plain JAX)
    flops = jnp.einsum('kb,k->b', weights, ops_cost.astype(jnp.float32))

    # Linearity of the candidate 1x1 convs: fold the mixture into per-batch
    # weights, kept in f32 (tiny, and avoids losing mixture mantissa bits).
    w_eff = jnp.einsum('kb,koc->boc', weights, op_weights.astype(jnp.float32))

    # Fold G batches per matmul via a block-diagonal weight: raises sublane/MXU
    # occupancy (C=4 alone uses 4/8 sublanes), shrinks the grid, and makes the
    # x DMA one contiguous slab per tile. Extra zero-multiplies are free (HBM-bound).
    G = _pick_batch_group(B, C, C_out)
    NG = B // G
    eye = jnp.eye(G, dtype=jnp.float32)
    w_bd = jnp.einsum('ngoc,gd->ngodc',
                      w_eff.reshape(NG, G, C_out, C), eye
                      ).reshape(NG, G * C_out, G * C)

    # Channels-first, spatial-in-lanes layout: pure reshape, no transpose, and
    # NO wrapper-side dtype conversion (x read from HBM once, in f32).
    x_flat = x_nchw.reshape(NG, G * C, S)

    # Pad spatial to a multiple of 128 -> lane-dense, unmasked vector stores.
    S_pad = ((S + 127) // 128) * 128
    if S_pad != S:
        x_flat = jnp.pad(x_flat, ((0, 0), (0, 0), (0, S_pad - S)))

    TS = _pick_spatial_tile(S_pad, NG, G * C, G * C_out)
    grid = (NG, S_pad // TS)

    out_bytes = jnp.dtype(out_dtype).itemsize
    cost = pl.CostEstimate(
        flops=2 * NG * (G * C_out) * (G * C) * S_pad,
        transcendentals=0,
        bytes_accessed=(x_flat.size * 4 + w_bd.size * 4
                        + NG * G * C_out * S_pad * out_bytes))

    y_flat = pl.pallas_call(
        _mixed_matmul_kernel,
        grid=grid,
        in_specs=[
            pl.BlockSpec((1, G * C_out, G * C), lambda n, s: (n, 0, 0)),
            pl.BlockSpec((1, G * C, TS), lambda n, s: (n, 0, s)),
        ],
        out_specs=pl.BlockSpec((1, G * C_out, TS), lambda n, s: (n, 0, s)),
        out_shape=jax.ShapeDtypeStruct((NG, G * C_out, S_pad), out_dtype),
        compiler_params=pltpu.CompilerParams(
            dimension_semantics=("parallel", "parallel")),
        cost_estimate=cost,
    )(w_bd, x_flat)

    # (NG, G*C_out, S_pad) -> (B, C_out, H, W): free reshapes + slice off padding.
    y = y_flat.reshape(B, C_out, S_pad)[:, :, :S].reshape(B, C_out, H, W)
    return y, flops


if __name__ == "__main__":
    root = jax.random.PRNGKey(0)
    k_x, k_w, k_g = jax.random.split(root, 3)

    B, C, H, W = 2, 4, 16, 16
    K = 3  # number of candidate ops (each a bias-free 1x1 conv)

    x = jax.random.normal(k_x, (B, C, H, W), dtype=jnp.float32)
    op_weights = 0.1 * jax.random.normal(k_w, (K, C, C), dtype=jnp.float32)

    # MixedModule.__init__ state (deterministic, in-script):
    arch_params = jnp.ones((K, 1), dtype=jnp.float32)        # gumble_arch_params
    temperature = jnp.float32(1.0)                           # gumbel_temperature
    ops_cost = jnp.arange(1, K + 1, dtype=jnp.float32)       # as if use_flops() ran

    y, flops = mixed_module_forward(
        x, op_weights, arch_params, temperature, ops_cost, key=k_g)
    jax.block_until_ready((y, flops))

    # Pure-JAX f32 reference (same gumbel key => identical mixture weights).
    logits = jnp.broadcast_to(arch_params, (K, B))
    w_mix = jax.nn.softmax(
        (logits + jax.random.gumbel(k_g, (K, B), dtype=jnp.float32)) / temperature,
        axis=0)
    ops_out = jnp.einsum('koc,bchw->kbohw', op_weights, x)   # (K, B, C_out, H, W)
    y_ref = jnp.sum(w_mix[:, :, None, None, None] * ops_out, axis=0)
    flops_ref = jnp.sum(w_mix * ops_cost[:, None], axis=0)

    # Kernel dots in f32 (f32 accumulation) -> tight tolerances.
    assert jnp.allclose(y, y_ref, atol=1e-4, rtol=1e-4), "output mismatch"
    assert jnp.allclose(flops, flops_ref, atol=1e-5, rtol=1e-5), "flops mismatch"
    print("KERNEL_OK")
</pallas_src>

<mosaic_0001>
module attributes {stable_mosaic.version = 11 : i64} {
  func.func @_mixed_matmul_kernel(%arg0: i32, %arg1: i32, %arg2: memref<1x8x8xf32, #tpu.memory_space<vmem>>, %arg3: memref<1x8x128xf32, #tpu.memory_space<vmem>>, %arg4: memref<1x8x128xf32, #tpu.memory_space<vmem>>) attributes {dimension_semantics = [#tpu.dimension_semantics<parallel>, #tpu.dimension_semantics<parallel>], iteration_bounds = array<i64: 1, 2>, scalar_prefetch = 0 : i64, scratch_operands = 0 : i64, tpu.core_type = #tpu.core_type<tc>, window_params = [{transform_indices = @transform_0, window_bounds = array<i64: 1, 8, 8>}, {transform_indices = @transform_1, window_bounds = array<i64: 1, 8, 128>}, {transform_indices = @transform_2, window_bounds = array<i64: 1, 8, 128>}]} {
    %c0 = arith.constant 0 : index
    %c0_0 = arith.constant 0 : index
    %c0_1 = arith.constant 0 : index
    %0 = vector.load %arg2[%c0, %c0_0, %c0_1] : memref<1x8x8xf32, #tpu.memory_space<vmem>>, vector<1x8x8xf32>
    %1 = vector.shape_cast %0 : vector<1x8x8xf32> to vector<8x8xf32>
    %c0_2 = arith.constant 0 : index
    %c0_3 = arith.constant 0 : index
    %c0_4 = arith.constant 0 : index
    %2 = vector.load %arg3[%c0_2, %c0_3, %c0_4] : memref<1x8x128xf32, #tpu.memory_space<vmem>>, vector<1x8x128xf32>
    %3 = vector.shape_cast %2 : vector<1x8x128xf32> to vector<8x128xf32>
    %cst = arith.constant dense<0.000000e+00> : vector<8x128xf32>
    %4 = tpu.matmul %1, %3, %cst {dimension_numbers = #tpu.dot_dimension_numbers<[1], [0], [0], [1], [0, 0, 1, 1], [], []>} : vector<8x8xf32>, vector<8x128xf32>, vector<8x128xf32> -> vector<8x128xf32>
    %c0_5 = arith.constant 0 : index
    %c0_6 = arith.constant 0 : index
    %c0_7 = arith.constant 0 : index
    %5 = vector.load %arg4[%c0_5, %c0_6, %c0_7] : memref<1x8x128xf32, #tpu.memory_space<vmem>>, vector<1x8x128xf32>
    %6 = vector.shape_cast %5 : vector<1x8x128xf32> to vector<8x128xf32>
    %7 = vector.shape_cast %4 : vector<8x128xf32> to vector<1x8x128xf32>
    tpu.vector_store %arg4[%c0_5, %c0_6, %c0_7], %7 {strides = array<i32>} : memref<1x8x128xf32, #tpu.memory_space<vmem>>, vector<1x8x128xf32>,
    return
  }
  func.func @transform_0(%arg0: i32, %arg1: i32) -> (i32, i32, i32) {
    %c0_i32 = arith.constant 0 : i32
    %c0_i32_0 = arith.constant 0 : i32
    %c0_i32_1 = arith.constant 0 : i32
    return %arg0, %c0_i32, %c0_i32_0 : i32, i32, i32
  }
  func.func @transform_1(%arg0: i32, %arg1: i32) -> (i32, i32, i32) {
    %c0_i32 = arith.constant 0 : i32
    %c0_i32_0 = arith.constant 0 : i32
    return %arg0, %c0_i32, %arg1 : i32, i32, i32
  }
  func.func @transform_2(%arg0: i32, %arg1: i32) -> (i32, i32, i32) {
    %c0_i32 = arith.constant 0 : i32
    %c0_i32_0 = arith.constant 0 : i32
    return %arg0, %c0_i32, %arg1 : i32, i32, i32
  }
}

</mosaic_0001>

<bundles_post_ra>
// kernel: tpu_custom_call.1
= control target key start
LH: loop header
LB: loop body
LE: loop exit
PB: predicated region body
PF: predicated region fallthrough
CT: control target
= control target key end

     0   :  { %7 = vsyncpa [#allocation3], 0  ;;  %s817_s0 = inlined_call_operand.hbm [shape: f32[1,8,8], index: 0, kind: input, shape index: {}]   ;;  %s818_s1 = inlined_call_operand.hbm [shape: f32[1,8,256], index: 1, kind: input, shape index: {}]   ;;  %s819_s2 = inlined_call_operand.hbm [shape: f32[1,8,256], index: 2, kind: output, shape index: {}]  }
   0x1   :  { %8 = vsyncpa [#allocation6], 0 }
   0x2   :  { %10 = vsyncpa [#allocation6 + $0x1], 0 }
   0x3   :  { %11 = vsyncpa [#allocation4], 0 }
   0x4   :  { %13 = vsyncpa [#allocation4 + $0x1], 0  ;;  %s644_s9 = smov 0   ;;  %s646_s10 = smov 0  }
   0x5   :  { %s648_s11 = smov 0   ;;  %s650_s12 = smov 0  }
   0x6   :  { %s652_s13 = smov 0   ;;  %s654_s14 = smov 0  }
   0x7 LB: > { %s386_s15 = sadd.s32 4294967295, %s622_s14   ;;  %s387_s16 = sadd.s32 4294967294, %s622_s14   ;;  %s622_s14 = sphi %s654_s14, %s19_s14   ;;  %s618_s13 = sphi %s652_s13, %s836_s13   ;;  %s614_s12 = sphi %s650_s12, %s835_s12   ;;  %s610_s11 = sphi %s648_s11, %s834_s11   ;;  %s606_s10 = sphi %s646_s10, %s833_s10   ;;  %s602_s9 = sphi %s644_s9, %s832_s9  }
   0x8   : > { %p79_p0 = scmp.ne.s32.totalorder %s606_s10, %s602_s9  ;;  %p678_p1 = scmp.eq.s32.totalorder %s386_s15, 0 }
   0x9   : > { %p682_p2 = scmp.eq.s32.totalorder %s386_s15, 1  ;;  %p111_p3 = scmp.eq.s32.totalorder %s387_s16, 1 }
   0xa   : > { %p688_p4 = por %p678_p1, %p79_p0  ;;  %p388_p5 = scmp.ge.s32.totalorder %s622_s14, 1 }
   0xb   : > { %p693_p6 = por %p111_p3, %p79_p0  ;;  %p118_p7 = scmp.lt.s32.totalorder %s622_s14, 3 }
   0xc   : > { %s823_s19 = scalar_select %p688_p4, 1, 0 }
   0xd   : > { %s824_s20 = scalar_select %p693_p6, 1, 0 }
   0xe   : > { %p698_p8 = pnand %p388_p5, %p118_p7  ;;  %s624_s22 = smov [#allocation2]  }
   0xf   : > { %s133_s23 = sshll.u32 %s624_s22, 4  ;;  %s28_s25 = sadd.s32 1, %s618_s13  ;;  %s134_s23 = int_to_ptr.vmem [resolvable:$true] %s133_s23 }
  0x10   : > { %p417_p10 = pneg %p698_p8  ;;  %s66_s26 = sadd.s32 1, %s610_s11 }
  0x11   : > { %p29_p12 = scmp.ge.s32.totalorder %s28_s25, 2  ;;  %s495_s27 = scalar_lea.vmem %s134_s23, 128 }
  0x12   : > { %p707_p11 = pnand %p417_p10, %p678_p1  ;;  %p496_p0 = scmp.ne.s32.totalorder %s134_s23, %s495_s27 }
  0x13   : > { %p503_p7 = scmp.lt.s32.totalorder %s134_s23, %s134_s23  ;;  %p504_p6 = scmp.lt.s32.totalorder %s495_s27, %s495_s27 }
  0x14   : > { %p486_p13 = pneg %p707_p11 }
  0x15   : > { %p505_p9 = por %p504_p6, %p503_p7 }
  0x16   : > { %p498_p3 = pnand %p496_p0, %p486_p13 }
  0x18   : > { %p499_p5 = pneg %p498_p3 }
  0x1a   : > { %p506_p4 = pnand %p505_p9, %p499_p5 }
  0x1c   : > { %509 = shalt.err (!%p506_p4)
}
  0x1d   : > { %420 = dma.hbm_to_vmem [thread:$0]  (!%p707_p11), %s817_s0, 128, %s134_s23, [#allocation3]  }
  0x1e   : > { %s838_s25 = smov (%p29_p12, %s28_s25), 0  ;;  %p73_p6 = scmp.ne.s32.totalorder %s610_s11, %s606_s10 }
  0x1f   : > { %p74_p4 = scmp.eq.s32.totalorder %s622_s14, 0  ;;  %s62_s30 = ssub.s32 %s618_s13, %s838_s25 }
  0x20   : > { %p430_p9 = scmp.lt.s32.totalorder %s622_s14, 2  ;;  %p64_p10 = scmp.eq.s32.totalorder %s62_s30, 0 }
  0x21   : > { %p75_p13 = por %p74_p4, %p73_p6  ;;  %p730_p0 = por %p682_p2, %p73_p6 }
  0x22   : > { %s144_s4 = sand.u32 1, %s610_s11   ;;  %s392_s7 = sshll.u32 %s618_s13, 7 }
  0x23   : > { %s736_s5 = scalar_select %p64_p10, %s610_s11, %s66_s26  }
  0x24   : > { %s391_s6 = sshll.u32 %s144_s4, 3  ;;  %s155_s16 = scalar_lea.hbm %s818_s1, %s392_s7 }
  0x25   : > { %s148_s22 = scalar_lea.vmem [#allocation5], %s391_s6  ;;  %p742_p11 = pnand %p430_p9, %p75_p13 }
  0x26   : > { %s157_s23 = sshll.u32 %s148_s22, 4  ;;  %s145_s18 = scalar_lea.sflag [#allocation6], %s144_s4  ;;  %s158_s23 = int_to_ptr.vmem [resolvable:$true] %s157_s23 }
  0x27   : > { %p512_p2 = pneg %p742_p11  ;;  %s523_s27 = scalar_lea.vmem %s158_s23, 128 }
  0x28   : > { %p524_p12 = scmp.ne.s32.totalorder %s158_s23, %s523_s27  ;;  %s625_s26 = smov [#allocation5]  }
  0x29   : > { %s528_s28 = sshll.u32 %s625_s26, 4  ;;  %s529_s28 = int_to_ptr.vmem [resolvable:$false] %s528_s28 }
  0x2a   : > { %p526_p3 = pnand %p524_p12, %p512_p2  ;;  %s530_s29 = scalar_lea.vmem %s529_s28, 256 }
  0x2b   : > { %p531_p7 = scmp.lt.s32.totalorder %s158_s23, %s529_s28  ;;  %p532_p6 = scmp.lt.s32.totalorder %s530_s29, %s523_s27 }
  0x2c   : > { %p527_p5 = pneg %p526_p3 }
  0x2d   : > { %p533_p4 = por %p532_p6, %p531_p7 }
  0x2f   : > { %p534_p10 = pnand %p533_p4, %p527_p5 }
  0x31   : > { %537 = shalt.err (!%p534_p10)
}
  0x32   : > { %424 = dma.hbm_to_vmem [thread:$0]  (!%p742_p11), %s155_s16, 128, %s158_s23, %s145_s18  }
  0x33   : > { %166 = sbr.rel (%p698_p8) target bundleno = 271 (0x10f), region = 28 }
  0x38   : > { %589 = dma.done.wait (%p678_p1), [#allocation3], 128  }
  0x39   : > { %591 = vsyncadd (%p678_p1), [#allocation3], 4294967168  ;;  %s757_s30 = sand.u32 1, %s606_s10   ;;  %p829_p9 = scmp.ne.s32.totalorder %s823_s19, 0 }
  0x3a   : > { %s395_s4 = sshll.u32 %s757_s30, 3  ;;  %s173_s6 = scalar_lea.sflag [#allocation6], %s757_s30 }
  0x3b   : > { %s176_s7 = scalar_lea.vmem [#allocation5], %s395_s4 }
  0x3c   : > { %593 = dma.done.wait (%p829_p9), %s173_s6, 128  }
  0x3d   : > { %595 = vsyncadd (%p829_p9), %s173_s6, 4294967168  ;;  %v626_v0 = vmov 0.0   ;;  %vm627_vm0 = vmmov 0   ;;  %vm199_vm1 = vcmask 64512   ;;  %v198_v1 = vld [vmem:[%s176_s7] sm:$0xff]  ;;  %v197_v2 = vld [vmem:[#allocation2] sm:$0xff] }
  0x3e   : > { %404 = vmatprep.subr.mxu0 %v626_v0  ;;  %406 = vmatprep.mubr.msk.f32.mxu0 %vm627_vm0, %v626_v0  ;;  %s196_s17 = scalar_lea.vmem [#allocation7], %s395_s4  ;;  %s399_s8 = sshll.u32 %s614_s12, 7 }
  0x3f   : > { %405 = vmatpush3.msra.mxu0 %v198_v1  ;;  %s290_s21 = sshll.u32 %s196_s17, 4  ;;  %s771_s16 = scalar_lea.hbm %s819_s2, %s399_s8  ;;  %s766_s21 = int_to_ptr.vmem [resolvable:$true] %s290_s21 }
  0x40   : > { %407 = vmatmul.mubr.msk.f32.vlgmr.msra.gmra.mxu0 %vm199_vm1, %v197_v2  ;;  %s275_s22 = scalar_lea.sflag [#allocation4], %s757_s30  ;;  %s538_s23 = scalar_lea.vmem %s766_s21, 128 }
  0x41   : > { %p539_p1 = scmp.ne.s32.totalorder %s766_s21, %s538_s23  ;;  %s628_s12 = smov [#allocation7]  }
  0x42   : > { %s542_s24 = sshll.u32 %s628_s12, 4  ;;  %s543_s24 = int_to_ptr.vmem [resolvable:$false] %s542_s24 }
  0x43   : > { %p540_p8 = pnand %p539_p1, %p730_p0  ;;  %s544_s18 = scalar_lea.vmem %s543_s24, 256 }
  0x44   : > { %p545_p11 = scmp.lt.s32.totalorder %s766_s21, %s543_s24  ;;  %p546_p2 = scmp.lt.s32.totalorder %s544_s18, %s538_s23 }
  0x45   : > { %p541_p13 = pneg %p540_p8 }
  0x46   : > { %p547_p12 = por %p546_p2, %p545_p11 }
  0x48   : > { %p548_p3 = pnand %p547_p12, %p541_p13 }
 0x100   : > { %v269_v3 = vpop.f32.mrf.mxu0 }
 0x101   : > { %273 = vst [vmem:[%s196_s17] sm:$0xff] %v269_v3 }
 0x102   : > { %v408_v4 = vpop.f32.mrf.mxu0 }
 0x103   : > { %551 = shalt.err (!%p548_p3)
}
 0x104   : > { %s552_s27 = scalar_lea.hbm %s771_s16, 128  ;;  %s556_s29 = scalar_lea.hbm %s819_s2, 256 }
 0x105   : > { %p553_p5 = scmp.ne.s32.totalorder %s771_s16, %s552_s27  ;;  %p557_p4 = scmp.lt.s32.totalorder %s771_s16, %s819_s2 }
 0x106   : > { %p558_p10 = scmp.lt.s32.totalorder %s556_s29, %s552_s27 }
 0x107   : > { %p554_p7 = pnand %p553_p5, %p730_p0 }
 0x108   : > { %p559_p9 = por %p558_p10, %p557_p4 }
 0x109   : > { %p555_p6 = pneg %p554_p7 }
 0x10b   : > { %p560_p1 = pnand %p559_p9, %p555_p6 }
 0x10d   : > { %563 = shalt.err (!%p560_p1)
}
 0x10e   : > { %415 = dma.vmem_to_hbm [thread:$0]  (%p730_p0), %s766_s21, 128, %s771_s16, %s275_s22  }
 0x10f PF: > { %s302_s6 = sand.u32 1, %s602_s9   ;;  %p830_p8 = scmp.ne.s32.totalorder %s824_s20, 0 }
 0x110   : > { %p831_p13 = scmp.ge.s32.totalorder %s622_s14, 2  ;;  %s303_s7 = scalar_lea.sflag [#allocation4], %s302_s6 }
 0x112   : > { %p426_p11 = pnand %p831_p13, %p830_p8 }
 0x114   : > { %p427_p2 = pneg %p426_p11 }
 0x116   : > { %597 = dma.done.wait (%p427_p2), %s303_s7, 128  }
 0x117   : > { %599 = vsyncadd (%p427_p2), %s303_s7, 4294967168  ;;  %s19_s14 = sadd.s32 1, %s622_s14   ;;  %s832_s9 = smov %s606_s10 }
 0x118   : > { %p16_p12 = scmp.ge.s32.totalorder %s19_s14, 4   ;;  %s833_s10 = smov %s610_s11 }
 0x119   : > { %s834_s11 = smov %s736_s5  ;;  %s835_s12 = smov %s618_s13 }
 0x11a   : > { %s836_s13 = smov %s838_s25  ;;  %18 = sbr.rel (!%p16_p12) target bundleno = 7 (0x7), region = 79 }
 0x11f   :  { %308 = vsyncpa [#allocation3], 1 }
 0x120   :  { %310 = vsyncpa [#allocation3 + $0x1], 1 }
 0x121   :  { %311 = vsyncpa [#allocation6], 1 }
 0x122   :  { %313 = vsyncpa [#allocation6 + $0x1], 1 }
 0x123   :  { %314 = vsyncpa [#allocation4], 1 }
 0x124   :  { %316 = vsyncpa [#allocation4 + $0x1], 1 }

</bundles_post_ra>
